<compile_context>
chip_gen: v7x
topology: tpu7x:2x2x1
jax: 0.10.0
libtpu: 0.0.40
codegen_flags: <defaults>
</compile_context>

<pallas_src>
import jax
import jax.numpy as jnp
from jax.experimental import pallas as pl
from jax.experimental.pallas import tpu as pltpu


def _additive_attention_kernel(f_ref, h_ref, wh_ref, wc_ref, b_ref, v_ref,
                               ctx_ref, alpha_ref):
    # f_ref:   (TB, P, E)   h_ref: (TB, H)
    # wh_ref:  (E, A)       wc_ref: (H, A)
    # b_ref:   (1, A)   == bh + bc folded (bv dropped: softmax shift-invariance)
    # v_ref:   (1, A)   == V weight as a lane row
    # ctx_ref: (TB, E)      alpha_ref: (TB, P)
    TB, P, E = f_ref.shape
    A = wh_ref.shape[1]

    f = f_ref[...]                                        # (TB, P, E)
    f2 = f.reshape(TB * P, E)                             # collapse batch+pixel rows

    # One batched MXU matmul for the Wh projection over the whole batch tile.
    wh = jnp.dot(f2, wh_ref[...], preferred_element_type=jnp.float32)          # (TB*P, A)
    # Wc projection for the tile; folded bias rides on the small (TB, A) slab.
    wc = jnp.dot(h_ref[...], wc_ref[...], preferred_element_type=jnp.float32)  # (TB, A)
    wc = wc + b_ref[...]

    s = jnp.tanh(wh.reshape(TB, P, A) + wc[:, None, :])                        # (TB, P, A)

    # V projection: VPU multiply + lane (A-axis) reduction -> lane-major scores.
    scores = jnp.sum(s * v_ref[...][None, :, :], axis=-1)                      # (TB, P)

    # Softmax over the pixel (lane) axis.
    m = jnp.max(scores, axis=-1, keepdims=True)
    e = jnp.exp(scores - m)
    alphas = e / jnp.sum(e, axis=-1, keepdims=True)                            # (TB, P)
    alpha_ref[...] = alphas

    # context[b] = sum_p alphas[b, p] * features[b, p, :]
    ctx_ref[...] = jnp.sum(f * alphas[:, :, None], axis=1)                     # (TB, E)


def _pick_batch_tile(B, P, E):
    """Batch-tile size: multiple of 8 (sublane alignment for 2-D (tb, X) blocks),
    capped so the double-buffered (tb, P, E) f32 feature tile stays small under
    v7x's 64 MiB VMEM, and small enough to leave >=2 parallel grid steps
    (v7x has 2 TensorCores) once the padded batch allows it."""
    feat_row_bytes = P * E * 4
    tb_vmem = max(8, ((4 * 1024 * 1024) // max(feat_row_bytes, 1)) // 8 * 8)
    b_pad8 = -(-B // 8) * 8
    tb_split = (b_pad8 // 2) // 8 * 8 if b_pad8 >= 16 else b_pad8
    return max(8, min(tb_vmem, tb_split, 256))


def additive_attention(features, hidden, params, *, tb=None):
    """features: (B, P, E) f32, hidden: (B, H) f32 -> (context (B,E), alphas (B,P))"""
    B, P, E = features.shape
    H = hidden.shape[1]
    A = params["wh_t"].shape[1]

    if tb is None:
        tb = _pick_batch_tile(B, P, E)
    n_tiles = -(-B // tb)
    b_pad = n_tiles * tb
    if b_pad != B:
        features = jnp.pad(features, ((0, b_pad - B), (0, 0), (0, 0)))
        hidden = jnp.pad(hidden, ((0, b_pad - B), (0, 0)))

    # Fold bh + bc into one bias row; drop bv entirely (softmax shift-invariant).
    bias = (params["bh"] + params["bc"]).reshape(1, A)
    v_row = params["v_t"].reshape(1, A)

    context_p, alphas_p = pl.pallas_call(
        _additive_attention_kernel,
        out_shape=(
            jax.ShapeDtypeStruct((b_pad, E), jnp.float32),
            jax.ShapeDtypeStruct((b_pad, P), jnp.float32),
        ),
        grid_spec=pltpu.PrefetchScalarGridSpec(
            num_scalar_prefetch=0,
            grid=(n_tiles,),
            in_specs=[
                pl.BlockSpec((tb, P, E), lambda i: (i, 0, 0)),  # features tile
                pl.BlockSpec((tb, H), lambda i: (i, 0)),        # hidden tile
                pl.BlockSpec((E, A), lambda i: (0, 0)),         # Wh^T (grid-invariant)
                pl.BlockSpec((H, A), lambda i: (0, 0)),         # Wc^T (grid-invariant)
                pl.BlockSpec((1, A), lambda i: (0, 0)),         # bh + bc
                pl.BlockSpec((1, A), lambda i: (0, 0)),         # V row
            ],
            out_specs=[
                pl.BlockSpec((tb, E), lambda i: (i, 0)),        # context (lane-dense)
                pl.BlockSpec((tb, P), lambda i: (i, 0)),        # alphas  (lane-dense)
            ],
        ),
        compiler_params=pltpu.CompilerParams(
            dimension_semantics=("parallel",),
            vmem_limit_bytes=32 * 1024 * 1024,
        ),
    )(features, hidden, params["wh_t"], params["wc_t"], bias, v_row)

    return context_p[:B], alphas_p[:B]


def init_params(key, encoder_size, hidden_size, attention_size):
    """Deterministic PyTorch-Linear-style init (U(-1/sqrt(fan_in), 1/sqrt(fan_in)))."""
    ks = jax.random.split(key, 6)

    def lin(kw, kb, fan_in, fan_out):
        bound = 1.0 / jnp.sqrt(fan_in)
        w_t = jax.random.uniform(kw, (fan_in, fan_out), jnp.float32, -bound, bound)
        b = jax.random.uniform(kb, (fan_out,), jnp.float32, -bound, bound)
        return w_t, b

    wc_t, bc = lin(ks[0], ks[1], hidden_size, attention_size)   # Wc: H -> A
    wh_t, bh = lin(ks[2], ks[3], encoder_size, attention_size)  # Wh: E -> A
    v_t, bv = lin(ks[4], ks[5], attention_size, 1)              # V:  A -> 1
    return {"wc_t": wc_t, "bc": bc, "wh_t": wh_t, "bh": bh, "v_t": v_t, "bv": bv}


def additive_attention_ref(features, hidden, p):
    """Pure-JAX reference mirroring the PyTorch forward exactly."""
    wh = features @ p["wh_t"] + p["bh"]                  # (B, P, A)
    wc = hidden @ p["wc_t"] + p["bc"]                    # (B, A)
    scores = jnp.tanh(wh + wc[:, None, :])               # (B, P, A)
    scores = (scores @ p["v_t"] + p["bv"])[..., 0]       # (B, P)
    alphas = jax.nn.softmax(scores, axis=1)              # (B, P)
    context = jnp.sum(features * alphas[..., None], axis=1)  # (B, E)
    return context, alphas


if __name__ == "__main__":
    B, P = 2, 8                 # batch_size, num_pixels
    E, H, A = 32, 16, 64        # encoder_size, hidden_size, attention_size

    key = jax.random.PRNGKey(0)
    k_feat, k_hid, k_param = jax.random.split(key, 3)
    features = jax.random.normal(k_feat, (B, P, E), jnp.float32)
    hidden = jax.random.normal(k_hid, (B, H), jnp.float32)
    params = init_params(k_param, E, H, A)

    context, alphas = additive_attention(features, hidden, params)
    jax.block_until_ready((context, alphas))

    ctx_ref, alp_ref = additive_attention_ref(features, hidden, params)
    assert context.shape == (B, E) and alphas.shape == (B, P)
    assert jnp.allclose(context, ctx_ref, atol=1e-5, rtol=1e-5)
    assert jnp.allclose(alphas, alp_ref, atol=1e-5, rtol=1e-5)

    print("KERNEL_OK")
</pallas_src>

<mosaic_0001>
module attributes {stable_mosaic.version = 11 : i64} {
  func.func @_additive_attention_kernel(%arg0: i32, %arg1: memref<8x8x32xf32, #tpu.memory_space<vmem>>, %arg2: memref<8x16xf32, #tpu.memory_space<vmem>>, %arg3: memref<32x64xf32, #tpu.memory_space<vmem>>, %arg4: memref<16x64xf32, #tpu.memory_space<vmem>>, %arg5: memref<1x64xf32, #tpu.memory_space<vmem>>, %arg6: memref<1x64xf32, #tpu.memory_space<vmem>>, %arg7: memref<8x32xf32, #tpu.memory_space<vmem>>, %arg8: memref<8x8xf32, #tpu.memory_space<vmem>>) attributes {dimension_semantics = [#tpu.dimension_semantics<parallel>], iteration_bounds = array<i64: 1>, scalar_prefetch = 0 : i64, scratch_operands = 0 : i64, tpu.core_type = #tpu.core_type<tc>, window_params = [{transform_indices = @transform_0, window_bounds = array<i64: 8, 8, 32>}, {transform_indices = @transform_1, window_bounds = array<i64: 8, 16>}, {pipeline_mode = #tpu.pipeline_mode<synchronous>, transform_indices = @transform_2, window_bounds = array<i64: 32, 64>}, {pipeline_mode = #tpu.pipeline_mode<synchronous>, transform_indices = @transform_3, window_bounds = array<i64: 16, 64>}, {pipeline_mode = #tpu.pipeline_mode<synchronous>, transform_indices = @transform_4, window_bounds = array<i64: 1, 64>}, {pipeline_mode = #tpu.pipeline_mode<synchronous>, transform_indices = @transform_5, window_bounds = array<i64: 1, 64>}, {transform_indices = @transform_6, window_bounds = array<i64: 8, 32>}, {transform_indices = @transform_7, window_bounds = array<i64: 8, 8>}]} {
    %c0 = arith.constant 0 : index
    %c0_0 = arith.constant 0 : index
    %c0_1 = arith.constant 0 : index
    %0 = vector.load %arg1[%c0, %c0_0, %c0_1] : memref<8x8x32xf32, #tpu.memory_space<vmem>>, vector<8x8x32xf32>
    %1 = vector.shape_cast %0 : vector<8x8x32xf32> to vector<64x32xf32>
    %c0_2 = arith.constant 0 : index
    %c0_3 = arith.constant 0 : index
    %2 = vector.load %arg3[%c0_2, %c0_3] : memref<32x64xf32, #tpu.memory_space<vmem>>, vector<32x64xf32>
    %cst = arith.constant dense<0.000000e+00> : vector<64x64xf32>
    %3 = tpu.matmul %1, %2, %cst {dimension_numbers = #tpu.dot_dimension_numbers<[1], [0], [0], [1], [0, 0, 1, 1], [], []>} : vector<64x32xf32>, vector<32x64xf32>, vector<64x64xf32> -> vector<64x64xf32>
    %c0_4 = arith.constant 0 : index
    %c0_5 = arith.constant 0 : index
    %4 = vector.load %arg2[%c0_4, %c0_5] : memref<8x16xf32, #tpu.memory_space<vmem>>, vector<8x16xf32>
    %c0_6 = arith.constant 0 : index
    %c0_7 = arith.constant 0 : index
    %5 = vector.load %arg4[%c0_6, %c0_7] : memref<16x64xf32, #tpu.memory_space<vmem>>, vector<16x64xf32>
    %cst_8 = arith.constant dense<0.000000e+00> : vector<8x64xf32>
    %6 = tpu.matmul %4, %5, %cst_8 {dimension_numbers = #tpu.dot_dimension_numbers<[1], [0], [0], [1], [0, 0, 1, 1], [], []>} : vector<8x16xf32>, vector<16x64xf32>, vector<8x64xf32> -> vector<8x64xf32>
    %c0_9 = arith.constant 0 : index
    %c0_10 = arith.constant 0 : index
    %7 = vector.load %arg5[%c0_9, %c0_10] : memref<1x64xf32, #tpu.memory_space<vmem>>, vector<1x64xf32>
    %8 = vector.broadcast %7 : vector<1x64xf32> to vector<8x64xf32>
    %9 = arith.addf %6, %8 : vector<8x64xf32>
    %10 = vector.shape_cast %3 : vector<64x64xf32> to vector<8x8x64xf32>
    %11 = vector.shape_cast %9 : vector<8x64xf32> to vector<8x1x64xf32>
    %12 = vector.broadcast %11 : vector<8x1x64xf32> to vector<8x8x64xf32>
    %13 = arith.addf %10, %12 : vector<8x8x64xf32>
    %14 = math.tanh %13 : vector<8x8x64xf32>
    %c0_11 = arith.constant 0 : index
    %c0_12 = arith.constant 0 : index
    %15 = vector.load %arg6[%c0_11, %c0_12] : memref<1x64xf32, #tpu.memory_space<vmem>>, vector<1x64xf32>
    %16 = vector.shape_cast %15 : vector<1x64xf32> to vector<1x1x64xf32>
    %17 = vector.broadcast %16 : vector<1x1x64xf32> to vector<8x8x64xf32>
    %18 = arith.mulf %14, %17 : vector<8x8x64xf32>
    %cst_13 = arith.constant dense<0.000000e+00> : vector<8x8xf32>
    %19 = vector.multi_reduction <add>, %18, %cst_13 [2] : vector<8x8x64xf32> to vector<8x8xf32>
    %cst_14 = arith.constant dense<0xFF800000> : vector<8xf32>
    %20 = vector.multi_reduction <maximumf>, %19, %cst_14 [1] : vector<8x8xf32> to vector<8xf32>
    %21 = vector.shape_cast %20 : vector<8xf32> to vector<8x1xf32>
    %22 = vector.broadcast %21 : vector<8x1xf32> to vector<8x8xf32>
    %23 = arith.subf %19, %22 : vector<8x8xf32>
    %24 = math.exp %23 : vector<8x8xf32>
    %cst_15 = arith.constant dense<0.000000e+00> : vector<8xf32>
    %25 = vector.multi_reduction <add>, %24, %cst_15 [1] : vector<8x8xf32> to vector<8xf32>
    %26 = vector.shape_cast %25 : vector<8xf32> to vector<8x1xf32>
    %27 = vector.broadcast %26 : vector<8x1xf32> to vector<8x8xf32>
    %28 = arith.divf %24, %27 : vector<8x8xf32>
    %c0_16 = arith.constant 0 : index
    %c0_17 = arith.constant 0 : index
    %29 = vector.load %arg8[%c0_16, %c0_17] : memref<8x8xf32, #tpu.memory_space<vmem>>, vector<8x8xf32>
    tpu.vector_store %arg8[%c0_16, %c0_17], %28 {strides = array<i32>} : memref<8x8xf32, #tpu.memory_space<vmem>>, vector<8x8xf32>,
    %30 = vector.shape_cast %28 : vector<8x8xf32> to vector<8x8x1xf32>
    %31 = vector.broadcast %30 : vector<8x8x1xf32> to vector<8x8x32xf32>
    %32 = arith.mulf %0, %31 : vector<8x8x32xf32>
    %cst_18 = arith.constant dense<0.000000e+00> : vector<8x32xf32>
    %33 = vector.multi_reduction <add>, %32, %cst_18 [1] : vector<8x8x32xf32> to vector<8x32xf32>
    %c0_19 = arith.constant 0 : index
    %c0_20 = arith.constant 0 : index
    %34 = vector.load %arg7[%c0_19, %c0_20] : memref<8x32xf32, #tpu.memory_space<vmem>>, vector<8x32xf32>
    tpu.vector_store %arg7[%c0_19, %c0_20], %33 {strides = array<i32>} : memref<8x32xf32, #tpu.memory_space<vmem>>, vector<8x32xf32>,
    return
  }
  func.func @transform_0(%arg0: i32) -> (i32, i32, i32) {
    %c0_i32 = arith.constant 0 : i32
    %c0_i32_0 = arith.constant 0 : i32
    %c0_i32_1 = arith.constant 0 : i32
    return %arg0, %c0_i32, %c0_i32_0 : i32, i32, i32
  }
  func.func @transform_1(%arg0: i32) -> (i32, i32) {
    %c0_i32 = arith.constant 0 : i32
    %c0_i32_0 = arith.constant 0 : i32
    return %arg0, %c0_i32 : i32, i32
  }
  func.func @transform_2(%arg0: i32) -> (i32, i32) {
    %c0_i32 = arith.constant 0 : i32
    %c0_i32_0 = arith.constant 0 : i32
    %c0_i32_1 = arith.constant 0 : i32
    return %c0_i32, %c0_i32_0 : i32, i32
  }
  func.func @transform_3(%arg0: i32) -> (i32, i32) {
    %c0_i32 = arith.constant 0 : i32
    %c0_i32_0 = arith.constant 0 : i32
    %c0_i32_1 = arith.constant 0 : i32
    return %c0_i32, %c0_i32_0 : i32, i32
  }
  func.func @transform_4(%arg0: i32) -> (i32, i32) {
    %c0_i32 = arith.constant 0 : i32
    %c0_i32_0 = arith.constant 0 : i32
    %c0_i32_1 = arith.constant 0 : i32
    return %c0_i32, %c0_i32_0 : i32, i32
  }
  func.func @transform_5(%arg0: i32) -> (i32, i32) {
    %c0_i32 = arith.constant 0 : i32
    %c0_i32_0 = arith.constant 0 : i32
    %c0_i32_1 = arith.constant 0 : i32
    return %c0_i32, %c0_i32_0 : i32, i32
  }
  func.func @transform_6(%arg0: i32) -> (i32, i32) {
    %c0_i32 = arith.constant 0 : i32
    %c0_i32_0 = arith.constant 0 : i32
    return %arg0, %c0_i32 : i32, i32
  }
  func.func @transform_7(%arg0: i32) -> (i32, i32) {
    %c0_i32 = arith.constant 0 : i32
    %c0_i32_0 = arith.constant 0 : i32
    return %arg0, %c0_i32 : i32, i32
  }
}

</mosaic_0001>

<bundles_post_ra>
// kernel: tpu_custom_call.1
= control target key start
LH: loop header
LB: loop body
LE: loop exit
PB: predicated region body
PF: predicated region fallthrough
CT: control target
= control target key end

     0   :  { %13 = vsyncpa [#allocation3], 0  ;;  %s1526_s0 = inlined_call_operand.hbm [shape: f32[8,8,32], index: 0, kind: input, shape index: {}]   ;;  %s1527_s1 = inlined_call_operand.hbm [shape: f32[8,16], index: 1, kind: input, shape index: {}]   ;;  %s1528_s2 = inlined_call_operand.hbm [shape: f32[32,64], index: 2, kind: input, shape index: {}]   ;;  %s1529_s3 = inlined_call_operand.hbm [shape: f32[16,64], index: 3, kind: input, shape index: {}]   ;;  %s1530_s4 = inlined_call_operand.vmem [shape: f32[1,64], index: 4, kind: input, shape index: {}]   ;;  %s1531_s5 = inlined_call_operand.vmem [shape: f32[1,64], index: 5, kind: input, shape index: {}]   ;;  %s1532_s6 = inlined_call_operand.hbm [shape: f32[8,32], index: 6, kind: output, shape index: {0}]   ;;  %s1533_s7 = inlined_call_operand.hbm [shape: f32[8,8], index: 7, kind: output, shape index: {1}]  }
   0x1   :  { %14 = vsyncpa [#allocation6], 0 }
   0x2   :  { %15 = vsyncpa [#allocation9], 0 }
   0x3   :  { %16 = vsyncpa [#allocation4], 0 }
   0x4   :  { %17 = vsyncpa [#allocation12], 0  ;;  %s1176_s24 = smov [#allocation5]   ;;  %s1177_s26 = smov [#allocation2]  }
   0x5   :  { %s36_s25 = sshll.u32 %s1176_s24, 4  ;;  %s23_s27 = sshll.u32 %s1177_s26, 4  ;;  %s37_s25 = int_to_ptr.vmem [resolvable:$true] %s36_s25  ;;  %s1229_s27 = int_to_ptr.vmem [resolvable:$true] %s23_s27 }
   0x6   :  { %s1034_s30 = scalar_lea.hbm %s1527_s1, 128 }
   0x7   :  { %p1035_p0 = scmp.ne.s32.totalorder %s1527_s1, %s1034_s30  ;;  %p1038_p1 = scmp.lt.u32.totalorder %s1034_s30, %s1527_s1 }
   0x9   :  { %p1040_p2 = pnand %p1038_p1, %p1035_p0 }
   0xb   :  { %1043 = shalt.err (!%p1040_p2)
}
   0xc   :  { %s1044_s12 = scalar_lea.vmem %s37_s25, 128  ;;  %p1049_p4 = scmp.lt.s32.totalorder %s37_s25, %s37_s25 }
   0xd   :  { %p1045_p3 = scmp.ne.s32.totalorder %s37_s25, %s1044_s12  ;;  %p1050_p5 = scmp.lt.s32.totalorder %s1044_s12, %s1044_s12 }
   0xf   :  { %p1051_p6 = por %p1050_p5, %p1049_p4 }
  0x11   :  { %p1052_p7 = pnand %p1051_p6, %p1045_p3 }
  0x13   :  { %1055 = shalt.err (!%p1052_p7)
}
  0x14   :  { %39 = dma.hbm_to_vmem [thread:$0]  %s1527_s1, 128, %s37_s25, [#allocation6]  }
  0x15   :  { %s1056_s17 = scalar_lea.hbm %s1526_s0, 1024 }
  0x16   :  { %p1057_p8 = scmp.ne.s32.totalorder %s1526_s0, %s1056_s17  ;;  %p1060_p9 = scmp.lt.u32.totalorder %s1056_s17, %s1526_s0 }
  0x18   :  { %p1062_p10 = pnand %p1060_p9, %p1057_p8 }
  0x1a   :  { %1065 = shalt.err (!%p1062_p10)
}
  0x1b   :  { %s1066_s22 = scalar_lea.vmem %s1229_s27, 1024  ;;  %p1071_p12 = scmp.lt.s32.totalorder %s1229_s27, %s1229_s27 }
  0x1c   :  { %p1067_p11 = scmp.ne.s32.totalorder %s1229_s27, %s1066_s22  ;;  %p1072_p13 = scmp.lt.s32.totalorder %s1066_s22, %s1066_s22 }
  0x1e   :  { %p1073_p0 = por %p1072_p13, %p1071_p12 }
  0x20   :  { %p1074_p1 = pnand %p1073_p0, %p1067_p11 }
  0x22   :  { %1077 = shalt.err (!%p1074_p1)
}
  0x23   :  { %s1178_s1 = smov 128   ;;  %s1179_s23 = smov 8  }
  0x24   :  { %29 = dma.hbm_to_vmem [thread:$0]  %s1526_s0, 1024, %s1229_s27, [#allocation3], %s1178_s1, %s1178_s1, %s1179_s23  }
  0x25   :  { %s1180_s26 = smov [#allocation7]   ;;  %s1181_s29 = smov [#allocation8]  }
  0x26   :  { %s45_s28 = sshll.u32 %s1180_s26, 4  ;;  %s57_s30 = sshll.u32 %s1181_s29, 4  ;;  %s46_s28 = int_to_ptr.vmem [resolvable:$true] %s45_s28  ;;  %s1263_s30 = int_to_ptr.vmem [resolvable:$true] %s57_s30 }
  0x27   :  { %s1078_s10 = scalar_lea.hbm %s1528_s2, 512 }
  0x28   :  { %p1079_p2 = scmp.ne.s32.totalorder %s1528_s2, %s1078_s10  ;;  %p1082_p3 = scmp.lt.u32.totalorder %s1078_s10, %s1528_s2 }
  0x2a   :  { %p1084_p4 = pnand %p1082_p3, %p1079_p2 }
  0x2c   :  { %1087 = shalt.err (!%p1084_p4)
}
  0x2d   :  { %s1088_s0 = scalar_lea.vmem %s46_s28, 512  ;;  %p1093_p6 = scmp.lt.s32.totalorder %s46_s28, %s46_s28 }
  0x2e   :  { %p1089_p5 = scmp.ne.s32.totalorder %s46_s28, %s1088_s0  ;;  %p1094_p7 = scmp.lt.s32.totalorder %s1088_s0, %s1088_s0 }
  0x30   :  { %p1095_p8 = por %p1094_p7, %p1093_p6 }
  0x32   :  { %p1096_p9 = pnand %p1095_p8, %p1089_p5 }
  0x34   :  { %1099 = shalt.err (!%p1096_p9)
}
  0x35   :  { %51 = dma.hbm_to_vmem [thread:$0]  %s1528_s2, 512, %s46_s28, [#allocation6], %s1178_s1, %s1178_s1, %s1179_s23  }
  0x36   :  { %s1100_s18 = scalar_lea.hbm %s1529_s3, 256 }
  0x37   :  { %p1101_p10 = scmp.ne.s32.totalorder %s1529_s3, %s1100_s18  ;;  %p1104_p11 = scmp.lt.u32.totalorder %s1100_s18, %s1529_s3 }
  0x39   :  { %p1106_p12 = pnand %p1104_p11, %p1101_p10 }
  0x3b   :  { %1109 = shalt.err (!%p1106_p12)
}
  0x3c   :  { %s1110_s24 = scalar_lea.vmem %s1263_s30, 256  ;;  %p1115_p0 = scmp.lt.s32.totalorder %s1263_s30, %s1263_s30 }
  0x3d   :  { %p1111_p13 = scmp.ne.s32.totalorder %s1263_s30, %s1110_s24  ;;  %p1116_p1 = scmp.lt.s32.totalorder %s1110_s24, %s1110_s24 }
  0x3f   :  { %p1117_p2 = por %p1116_p1, %p1115_p0 }
  0x41   :  { %p1118_p3 = pnand %p1117_p2, %p1111_p13 }
  0x43   :  { %1121 = shalt.err (!%p1118_p3)
}
  0x44   :  { %63 = dma.hbm_to_vmem [thread:$0]  %s1529_s3, 256, %s1263_s30, [#allocation9], %s1178_s1, %s1178_s1, %s1179_s23  }
  0x45   :  { %1166 = dma.done.wait [#allocation3], 1024  }
  0x46   :  { %1167 = vsyncadd [#allocation3], 4294966272 }
  0x47   :  { %1168 = dma.done.wait [#allocation6], 640  }
  0x48   :  { %1169 = vsyncadd [#allocation6], 4294966656 }
  0x49   :  { %1170 = dma.done.wait [#allocation9], 256  }
  0x4a   :  { %1171 = vsyncadd [#allocation9], 4294967040  ;;  %vm92_vm0 = vcmask 261120   ;;  %v88_v0 = vld [vmem:[#allocation7] sm:$0xff]  ;;  %v89_v1 = vld [vmem:[#allocation7 + $0x8] sm:$0xff]  ;;  %v1182_v13 = vmov 0.0|0.0   ;;  %v311_v22 = vlaneseq }
  0x4b   :  { %v90_v2 = vld [vmem:[#allocation7 + $0x10] sm:$0xff]  ;;  %v956_v3 = vpack.c.bf16 %v89_v1, %v88_v0  ;;  %v91_v4 = vld [vmem:[#allocation7 + $0x18] sm:$0xff]  ;;  %v1300_v5 = vld [vmem:[#allocation2 + $0x30] sm:$0xff]  ;;  %vm1183_vm1 = vmmov 0   ;;  %v1184_v15 = vmov 0.0   ;;  %vm232_vm2 = vcmask 130048  }
  0x4c   :  { %v960_v6 = vpack.c.bf16 %v91_v4, %v90_v2  ;;  %946 = vmatprep.mubr.msk.f32.mxu1 %vm92_vm0, %v1300_v5  ;;  %v1304_v7 = vld [vmem:[#allocation2] sm:$0xff]  ;;  %v223_v8 = vld [vmem:[#allocation8] sm:$0xff]  ;;  %v224_v9 = vld [vmem:[#allocation8 + $0x8] sm:$0xff]  ;;  %v1185_v20 = vmov 1966171168   ;;  %v1333_v24 = vshrl.u32 %v311_v22, 7 }
  0x4d   :  { %967 = vmatprep.subr.bf16.mxu1 %v956_v3  ;;  %957 = vmatprep.subr.bf16.mxu0 %v956_v3  ;;  %v1308_v10 = vld [vmem:[#allocation2 + $0x38] sm:$0xff]  ;;  %v965_v11 = vpack.c.bf16 %v224_v9, %v223_v8  ;;  %v1310_v12 = vld [vmem:[#allocation2 + $0x8] sm:$0xff]  ;;  %v1312_v14 = vld [vmem:[#allocation2 + $0x10] sm:$0xff]  ;;  %v309_v21 = vunpack.c.l.s4 %v1185_v20  ;;  %vm427_vm3 = vcmask 523264   ;;  %vm494_vm4 = vcmask 1041409  }
  0x4e   :  { %969 = vmatpush3.bf16.msra.mxu1 %v956_v3  ;;  %959 = vmatpush3.bf16.msra.mxu0 %v956_v3  ;;  %v222_v16 = vld [vmem:[#allocation5] sm:$0xff]  ;;  %v1318_v17 = vld [vmem:[#allocation2 + $0x18] sm:$0xff]  ;;  %v1328_v19 = vld [vmem:[#allocation2 + $0x28] sm:$0xff]  ;;  %v1340_v38 = vsub.s32 0, %v1333_v24  ;;  %vm496_vm5 = vcmask 1042434   ;;  %vm498_vm6 = vcmask 1043459  }
  0x4f   :  { %968 = vmatprep.subr.bf16.mxu1 %v960_v6  ;;  %961 = vmatprep.subr.bf16.mxu0 %v960_v6  ;;  %v1322_v18 = vld [vmem:[#allocation2 + $0x20] sm:$0xff]  ;;  %v310_v23 = vunpack.c.0.s8 %v309_v21  ;;  %vm500_vm7 = vcmask 1044484   ;;  %vm502_vm8 = vcmask 1045509   ;;  %vm504_vm9 = vcmask 1046534  }
  0x50   :  { %937 = vmatprep.mubr.msk.f32.mxu0 %vm92_vm0, %v1304_v7  ;;  %v911_v29 = vld [vmem:[%s1530_s4] ss:$0 sm:$0xff]  ;;  %vm506_vm10 = vcmask 1047559   ;;  %vm509_vm11 = vcmask 64512  }
  0x51   :  { %v313_v30 = vsub.s32 %v310_v23, %v1333_v24  ;;  %v913_v4 = vld [vmem:[%s1531_s5] ss:$0 sm:$0xff]  ;;  %s1187_s5 = smov [#allocation11]  }
  0x52   :  { %970 = vmatpush3.bf16.msra.mxu1 %v960_v6  ;;  %963 = vmatpush3.bf16.msra.mxu0 %v960_v6  ;;  %s888_s26 = sshll.u32 %s1187_s5, 4  ;;  %s889_s26 = int_to_ptr.vmem [resolvable:$true] %s888_s26 }
  0x53   :  { %964 = vmatprep.subr.bf16.mxu1 %v1182_v13  ;;  %s1122_s28 = scalar_lea.vmem %s889_s26, 128  ;;  %p1127_p5 = scmp.lt.s32.totalorder %s889_s26, %s889_s26 }
  0x54   :  { %p1123_p4 = scmp.ne.s32.totalorder %s889_s26, %s1122_s28  ;;  %p1128_p6 = scmp.lt.s32.totalorder %s1122_s28, %s1122_s28 }
  0x55   :  { %947 = vmatmul.mubr.msk.f32.vlgmr.msra.gmra.mrb[0].mxu1 %vm92_vm0, %v1308_v10  ;;  %938 = vmatmul.mubr.msk.f32.vlgmr.msra.gmra.mrb[0].mxu0 %vm92_vm0, %v1310_v12 }
  0x56   :  { %966 = vmatpush3.bf16.msra.mxu1 %v965_v11  ;;  %953 = vmatprep.mubr.msk.f32.mxu1 %vm1183_vm1, %v1184_v15  ;;  %p1129_p7 = por %p1128_p6, %p1127_p5 }
  0x57   :  { %940 = vmatprep.mubr.msk.f32.mxu0 %vm92_vm0, %v1312_v14 }
  0x58   :  { %p1130_p8 = pnand %p1129_p7, %p1123_p4 }
  0x59   :  { %954 = vmatmul.mubr.msk.f32.vlgmr.msra.gmra.mrb[2].mxu1 %vm232_vm2, %v222_v16  ;;  %941 = vmatmul.mubr.msk.f32.gmra.mrb[2].mxu0 %vm92_vm0, %v1318_v17 }
  0x5a   :  { %943 = vmatprep.mubr.msk.f32.mxu0 %vm92_vm0, %v1322_v18 }
  0x5d   :  { %944 = vmatmul.mubr.msk.f32.gmra.mrb[4].mxu0 %vm92_vm0, %v1328_v19 }
 0x128   :  { %v948_v25 = vpop.f32.mrb[0].mxu1  ;;  %v939_v26 = vpop.f32.mrb[0].mxu0 }
 0x129   :  { %v213_v27 = vpop.f32.mrb[1].mxu1  ;;  %v183_v28 = vpop.f32.mrb[1].mxu0 }
 0x12c   :  { %v302_v31 = vpop.f32.mrb[2].mxu1  ;;  %v942_v32 = vpop.f32.mrb[2].mxu0 }
 0x12d   :  { %v303_v33 = vadd.f32 %v911_v29, %v302_v31  ;;  %v955_v34 = vpop.f32.mrb[3].mxu1  ;;  %v193_v35 = vpop.f32.mrb[3].mxu0 }
 0x12f   :  { %v307_v36 = vcombine.high %v303_v33, %v303_v33  ;;  %v314_v37 = vrot.slane %v303_v33, %v313_v30 }
 0x130   :  { %v945_v39 = vpop.f32.mrb[4].mxu0 }
 0x131   :  { %v321_v40 = vrot.slane %v307_v36, %v313_v30  ;;  %v322_v41 = vcombine.high %v314_v37, %v314_v37  ;;  %v330_v42 = vrot.slane %v314_v37, %v313_v30  ;;  %v203_v43 = vpop.f32.mrb[5].mxu0 }
 0x133   :  { %v344_v44 = vrot.slane %v322_v41, %v313_v30  ;;  %v359_v45 = vrot.slane %v330_v42, %v1340_v38  ;;  %v352_v46 = vcombine.high %v330_v42, %v330_v42  ;;  %v323_v47 = vcombine.high %v321_v40, %v321_v40 }
 0x134   :  { %v337_v48 = vrot.slane %v321_v40, %v313_v30  ;;  %v461_v40 = vand.u32 127, %v311_v22 }
 0x135   :  { %v363_v49 = vrot.slane %v344_v44, %v1340_v38  ;;  %v396_v50 = vadd.f32 %v359_v45, %v183_v28  ;;  %v354_v51 = vcombine.high %v344_v44, %v344_v44  ;;  %v367_v52 = vrot.slane %v352_v46, %v1340_v38 }
 0x136   :  { %v351_v53 = vrot.slane %v323_v47, %v313_v30  ;;  %v353_v54 = vcombine.high %v337_v48, %v337_v48  ;;  %v375_v55 = vrot.slane %v337_v48, %v1340_v38  ;;  %v1363_v42 = vsub.s32 %v461_v40, %v1333_v24 }
 0x137   :  { %v397_v56 = vadd.f32 %v939_v26, %v363_v49  ;;  %986 = vtanh.f32 %v396_v50  ;;  %v371_v57 = vrot.slane %v354_v51, %v1340_v38  ;;  %v398_v58 = vadd.f32 %v367_v52, %v193_v35 }
 0x138   :  { %v355_v59 = vcombine.high %v351_v53, %v351_v53  ;;  %v379_v60 = vrot.slane %v351_v53, %v1340_v38  ;;  %v383_v61 = vrot.slane %v353_v54, %v1340_v38  ;;  %v400_v62 = vadd.f32 %v375_v55, %v203_v43 }
 0x139   :  { %988 = vtanh.f32 %v397_v56  ;;  %v399_v63 = vadd.f32 %v942_v32, %v371_v57 }
 0x13a   :  { %990 = vtanh.f32 %v398_v58  ;;  %v387_v0 = vrot.slane %v355_v59, %v1340_v38  ;;  %v401_v1 = vadd.f32 %v945_v39, %v379_v60  ;;  %v402_v2 = vadd.f32 %v383_v61, %v213_v27 }
 0x13b   :  { %992 = vtanh.f32 %v399_v63 }
 0x13c   :  { %v403_v3 = vadd.f32 %v948_v25, %v387_v0  ;;  %994 = vtanh.f32 %v400_v62 }
 0x13d   :  { %996 = vtanh.f32 %v401_v1  ;;  %v1186_v1 = vmov 0  }
 0x13e   :  { %998 = vtanh.f32 %v402_v2  ;;  %985 = vset.pattern.permute.xlu0 %v1186_v1  ;;  %984 = vset.pattern.permute.xlu1 %v1186_v1  ;;  %v520_v2 = vsub.s32 1, %v1333_v24 }
 0x13f   :  { %1000 = vtanh.f32 %v403_v3  ;;  %v524_v3 = vsub.s32 2, %v1333_v24 }
 0x141   :  { %v987_v6 = vpop.eup %986 }
 0x142   :  { %v419_v8 = vmul.f32 %v987_v6, %v913_v4 }
 0x143   :  { %v989_v9 = vpop.eup %988 }
 0x144   :  { %v991_v11 = vpop.eup %990  ;;  %v428_v13 = vsel %vm427_vm3, %v419_v8, 0.0  ;;  %v420_v15 = vmul.f32 %v989_v9, %v913_v4 }
 0x145   :  { %v993_v16 = vpop.eup %992  ;;  %429 = vadd.xlane.f32.xlu0 %v428_v13  ;;  %v421_v20 = vmul.f32 %v991_v11, %v913_v4  ;;  %v532_v13 = vsub.s32 4, %v1333_v24 }
 0x146   :  { %v995_v21 = vpop.eup %994  ;;  %v422_v25 = vmul.f32 %v993_v16, %v913_v4  ;;  %v431_v27 = vsel %vm427_vm3, %v420_v15, 0.0 }
 0x147   :  { %v434_v23 = vsel %vm427_vm3, %v421_v20, 0.0  ;;  %v997_v26 = vpop.eup %996  ;;  %v423_v28 = vmul.f32 %v995_v21, %v913_v4 }
 0x148   :  { %435 = vadd.xlane.f32.xlu1 %v434_v23  ;;  %v999_v29 = vpop.eup %998  ;;  %v437_v30 = vsel %vm427_vm3, %v422_v25, 0.0  ;;  %v424_v31 = vmul.f32 %v997_v26, %v913_v4  ;;  %v536_v26 = vsub.s32 5, %v1333_v24 }
 0x149   :  { %432 = vadd.xlane.f32.xlu0 %v431_v27  ;;  %v1001_v32 = vpop.eup %1000  ;;  %v440_v33 = vsel %vm427_vm3, %v423_v28, 0.0  ;;  %v425_v34 = vmul.f32 %v999_v29, %v913_v4 }
 0x14a   :  { %v443_v35 = vsel %vm427_vm3, %v424_v31, 0.0  ;;  %v426_v36 = vmul.f32 %v1001_v32, %v913_v4  ;;  %v528_v4 = vsub.s32 3, %v1333_v24 }
 0x14b   :  { %v446_v37 = vsel %vm427_vm3, %v425_v34, 0.0  ;;  %v544_v34 = vsub.s32 7, %v1333_v24 }
 0x14c   :  { %438 = vadd.xlane.f32.xlu1 %v437_v30  ;;  %v449_v39 = vsel %vm427_vm3, %v426_v36, 0.0  ;;  %v540_v30 = vsub.s32 6, %v1333_v24 }
 0x14d   :  { %441 = vadd.xlane.f32.xlu0 %v440_v33 }
 0x150   :  { %444 = vadd.xlane.f32.xlu1 %v443_v35 }
 0x151   :  { %447 = vadd.xlane.f32.xlu0 %v446_v37 }
 0x154   :  { %450 = vadd.xlane.f32.xlu1 %v449_v39 }
 0x1d2   :  { %v430_v41 = vpop.xlane.xlu0 %429 }
 0x1d3   :  { %v465_v45 = vrot.slane %v430_v41, %v1363_v42 }
 0x1d5   :  { %v436_v43 = vpop.xlane.xlu1 %435 }
 0x1d6   :  { %v433_v44 = vpop.xlane.xlu0 %432  ;;  %v473_v47 = vrot.slane %v436_v43, %v1363_v42 }
 0x1d7   :  { %v469_v46 = vrot.slane %v433_v44, %v1363_v42 }
 0x1d9   :  { %v495_v48 = vsel %vm494_vm4, %v469_v46, %v465_v45  ;;  %v439_v49 = vpop.xlane.xlu1 %438 }
 0x1da   :  { %v497_v22 = vsel %vm496_vm5, %v473_v47, %v495_v48  ;;  %v477_v50 = vrot.slane %v439_v49, %v1363_v42  ;;  %v442_v51 = vpop.xlane.xlu0 %441 }
 0x1db   :  { %v481_v52 = vrot.slane %v442_v51, %v1363_v42 }
 0x1dc   :  { %v499_v53 = vsel %vm498_vm6, %v477_v50, %v497_v22 }
 0x1dd   :  { %v501_v54 = vsel %vm500_vm7, %v481_v52, %v499_v53  ;;  %v445_v55 = vpop.xlane.xlu1 %444 }
 0x1de   :  { %v485_v56 = vrot.slane %v445_v55, %v1363_v42  ;;  %v448_v57 = vpop.xlane.xlu0 %447 }
 0x1df   :  { %v489_v58 = vrot.slane %v448_v57, %v1363_v42 }
 0x1e0   :  { %v503_v59 = vsel %vm502_vm8, %v485_v56, %v501_v54 }
 0x1e1   :  { %v451_v60 = vpop.xlane.xlu1 %450  ;;  %v505_v61 = vsel %vm504_vm9, %v489_v58, %v503_v59 }
 0x1e2   :  { %v493_v62 = vrot.slane %v451_v60, %v1363_v42 }
 0x1e4   :  { %v507_v63 = vsel %vm506_vm10, %v493_v62, %v505_v61 }
 0x1e5   :  { %v510_v0 = vsel %vm509_vm11, %v507_v63, -inf }
 0x1e6   :  { %511 = vmax.xlane.f32.xlu0 %v510_v0 }
 0x273   :  { %v512_v6 = vpop.xlane.xlu0 %511 }
 0x274   :  { %v517_v8 = vrot.slane %v512_v6, %v1340_v38  ;;  %v521_v9 = vrot.slane %v512_v6, %v520_v2  ;;  %v525_v11 = vrot.slane %v512_v6, %v524_v3  ;;  %v529_v15 = vrot.slane %v512_v6, %v528_v4 }
 0x275   :  { %v533_v27 = vrot.slane %v512_v6, %v532_v13  ;;  %v537_v31 = vrot.slane %v512_v6, %v536_v26  ;;  %v541_v35 = vrot.slane %v512_v6, %v540_v30 }
 0x276   :  { %v554_v16 = vsub.f32 %v430_v41, %v517_v8  ;;  %v555_v20 = vsub.f32 %v433_v44, %v521_v9  ;;  %v556_v21 = vsub.f32 %v436_v43, %v525_v11  ;;  %v557_v28 = vsub.f32 %v439_v49, %v529_v15 }
 0x277   :  { %v558_v32 = vsub.f32 %v442_v51, %v533_v27  ;;  %v559_v36 = vsub.f32 %v445_v55, %v537_v31  ;;  %v545_v41 = vrot.slane %v512_v6, %v544_v34  ;;  %v560_v43 = vsub.f32 %v448_v57, %v541_v35 }
 0x278   :  { %v562_v23 = vmul.f32 1.442695, %v554_v16  ;;  %v564_v25 = vmul.f32 1.442695, %v555_v20  ;;  %v566_v29 = vmul.f32 1.442695, %v556_v21 }
 0x279   :  { %v568_v33 = vmul.f32 1.442695, %v557_v28  ;;  %v570_v37 = vmul.f32 1.442695, %v558_v32  ;;  %v572_v44 = vmul.f32 1.442695, %v559_v36  ;;  %v561_v46 = vsub.f32 %v451_v60, %v545_v41 }
 0x27a   :  { %1002 = vpow2.f32 %v562_v23  ;;  %v574_v47 = vmul.f32 1.442695, %v560_v43 }
 0x27b   :  { %1004 = vpow2.f32 %v564_v25  ;;  %v576_v49 = vmul.f32 1.442695, %v561_v46 }
 0x27c   :  { %1006 = vpow2.f32 %v566_v29 }
 0x27d   :  { %1008 = vpow2.f32 %v568_v33 }
 0x27e   :  { %1010 = vpow2.f32 %v570_v37 }
 0x27f   :  { %1012 = vpow2.f32 %v572_v44 }
 0x280   :  { %1014 = vpow2.f32 %v574_v47 }
 0x281   :  { %1016 = vpow2.f32 %v576_v49 }
 0x284   :  { %v1003_v39 = vpop.eup %1002 }
 0x285   :  { %v1401_v40 = vpop.eup %1004  ;;  %587 = vperm.xlu1 %984, %v1003_v39  }
 0x286   :  { %590 = vperm.xlu0 %985, %v1401_v40   ;;  %v1406_v45 = vpop.eup %1006 }
 0x287   :  { %v1409_v48 = vpop.eup %1008 }
 0x288   :  { %v1412_v22 = vpop.eup %1010 }
 0x289   :  { %593 = vperm.xlu1 %984, %v1406_v45   ;;  %v1415_v50 = vpop.eup %1012 }
 0x28a   :  { %v1418_v51 = vpop.eup %1014 }
 0x28b   :  { %v1421_v52 = vpop.eup %1016 }
 0x28d   :  { %596 = vperm.xlu1 %984, %v1409_v48  }
 0x291   :  { %599 = vperm.xlu1 %984, %v1412_v22  }
 0x295   :  { %602 = vperm.xlu1 %984, %v1415_v50  }
 0x299   :  { %605 = vperm.xlu1 %984, %v1418_v51  }
 0x29d   :  { %608 = vperm.xlu1 %984, %v1421_v52  }
 0x304   :  { %v588_v53 = vpop.permute.xlu1 %587 }
 0x305   :  { %v591_v57 = vpop.permute.xlu0 %590  ;;  %v613_v60 = vrot.slane %v588_v53, %v1363_v42 }
 0x306   :  { %v617_v59 = vrot.slane %v591_v57, %v1363_v42 }
 0x308   :  { %v594_v54 = vpop.permute.xlu1 %593  ;;  %v642_v1 = vsel %vm494_vm4, %v617_v59, %v613_v60 }
 0x309   :  { %v621_v61 = vrot.slane %v594_v54, %v1363_v42 }
 0x30b   :  { %v643_v8 = vsel %vm496_vm5, %v621_v61, %v642_v1 }
 0x30c   :  { %v597_v55 = vpop.permute.xlu1 %596 }
 0x30d   :  { %v625_v62 = vrot.slane %v597_v55, %v1363_v42 }
 0x30f   :  { %v644_v11 = vsel %vm498_vm6, %v625_v62, %v643_v8 }
 0x310   :  { %v600_v56 = vpop.permute.xlu1 %599 }
 0x311   :  { %v629_v63 = vrot.slane %v600_v56, %v1363_v42 }
 0x313   :  { %v645_v15 = vsel %vm500_vm7, %v629_v63, %v644_v11 }
 0x314   :  { %v603_v58 = vpop.permute.xlu1 %602 }
 0x315   :  { %v633_v6 = vrot.slane %v603_v58, %v1363_v42 }
 0x317   :  { %v646_v20 = vsel %vm502_vm8, %v633_v6, %v645_v15 }
 0x318   :  { %v606_v0 = vpop.permute.xlu1 %605 }
 0x319   :  { %v637_v9 = vrot.slane %v606_v0, %v1363_v42 }
 0x31b   :  { %v647_v23 = vsel %vm504_vm9, %v637_v9, %v646_v20 }
 0x31c   :  { %v609_v16 = vpop.permute.xlu1 %608 }
 0x31d   :  { %v641_v21 = vrot.slane %v609_v16, %v1363_v42 }
 0x31f   :  { %v648_v25 = vsel %vm506_vm10, %v641_v21, %v647_v23 }
 0x320   :  { %v650_v27 = vsel %vm509_vm11, %v648_v25, 0.0 }
 0x321   :  { %651 = vadd.xlane.f32.xlu1 %v650_v27 }
 0x3ae   :  { %v652_v28 = vpop.xlane.xlu1 %651 }
 0x3af   :  { %v657_v29 = vrot.slane %v652_v28, %v1340_v38  ;;  %v661_v31 = vrot.slane %v652_v28, %v520_v2  ;;  %v665_v32 = vrot.slane %v652_v28, %v524_v3  ;;  %v669_v33 = vrot.slane %v652_v28, %v528_v4 }
 0x3b0   :  { %v673_v36 = vrot.slane %v652_v28, %v532_v13  ;;  %v677_v38 = vrot.slane %v652_v28, %v536_v26  ;;  %v681_v3 = vrot.slane %v652_v28, %v540_v30  ;;  %v685_v13 = vrot.slane %v652_v28, %v544_v34 }
 0x3b1   :  { %1018 = vrcp.f32 %v657_v29 }
 0x3b2   :  { %1020 = vrcp.f32 %v661_v31 }
 0x3b3   :  { %1022 = vrcp.f32 %v665_v32 }
 0x3b4   :  { %1024 = vrcp.f32 %v669_v33 }
 0x3b5   :  { %1026 = vrcp.f32 %v673_v36 }
 0x3b6   :  { %1028 = vrcp.f32 %v677_v38 }
 0x3b7   :  { %1030 = vrcp.f32 %v681_v3 }
 0x3b8   :  { %1032 = vrcp.f32 %v685_v13 }
 0x3bb   :  { %v1019_v35 = vpop.eup %1018 }
 0x3bc   :  { %v695_v37 = vmul.f32 %v1019_v35, %v1003_v39  ;;  %v1021_v41 = vpop.eup %1020 }
 0x3bd   :  { %v697_v2 = vmul.f32 %v1021_v41, %v1401_v40  ;;  %v1023_v43 = vpop.eup %1022 }
 0x3be   :  { %719 = vperm.xlu0 %985, %v695_v37   ;;  %v699_v4 = vmul.f32 %v1023_v43, %v1406_v45  ;;  %v1025_v44 = vpop.eup %1024 }
 0x3bf   :  { %v701_v39 = vmul.f32 %v1025_v44, %v1409_v48  ;;  %v1027_v46 = vpop.eup %1026 }
 0x3c0   :  { %v703_v26 = vmul.f32 %v1027_v46, %v1412_v22  ;;  %v1029_v40 = vpop.eup %1028 }
 0x3c1   :  { %v705_v47 = vmul.f32 %v1029_v40, %v1415_v50  ;;  %v1031_v30 = vpop.eup %1030 }
 0x3c2   :  { %722 = vperm.xlu0 %985, %v697_v2   ;;  %v707_v45 = vmul.f32 %v1031_v30, %v1418_v51  ;;  %v1033_v49 = vpop.eup %1032 }
 0x3c3   :  { %v709_v24 = vmul.f32 %v1033_v49, %v1421_v52 }
 0x3c6   :  { %725 = vperm.xlu0 %985, %v699_v4  }
 0x3ca   :  { %728 = vperm.xlu0 %985, %v701_v39  }
 0x3ce   :  { %731 = vperm.xlu0 %985, %v703_v26  }
 0x3d2   :  { %734 = vperm.xlu0 %985, %v705_v47  }
 0x3d6   :  { %737 = vperm.xlu0 %985, %v707_v45  }
 0x3da   :  { %740 = vperm.xlu0 %985, %v709_v24  }
 0x43d   :  { %v720_v34 = vpop.permute.xlu0 %719 }
 0x43e   :  { %v791_v54 = vmul.f32 %v720_v34, %v1304_v7  ;;  %v745_v15 = vrot.slane %v720_v34, %v1363_v42 }
 0x440   :  { %v799_v56 = vsel %vm92_vm0, %v791_v54, 0.0 }
 0x441   :  { %v723_v48 = vpop.permute.xlu0 %722  ;;  %v800_v59 = vrot.slane %v799_v56, 4 }
 0x442   :  { %v792_v53 = vmul.f32 %v723_v48, %v1310_v12  ;;  %v749_v11 = vrot.slane %v723_v48, %v1363_v42 }
 0x444   :  { %v806_v50 = vsel %vm92_vm0, %v792_v53, 0.0  ;;  %v774_v33 = vsel %vm494_vm4, %v749_v11, %v745_v15 }
 0x445   :  { %v726_v22 = vpop.permute.xlu0 %725  ;;  %v807_v52 = vrot.slane %v806_v50, 4 }
 0x446   :  { %v793_v55 = vmul.f32 %v726_v22, %v1312_v14  ;;  %v801_v14 = vadd.f32 %v800_v59, %v799_v56  ;;  %v753_v20 = vrot.slane %v726_v22, %v1363_v42 }
 0x447   :  { %v808_v63 = vadd.f32 %v807_v52, %v806_v50 }
 0x448   :  { %v813_v51 = vsel %vm92_vm0, %v793_v55, 0.0  ;;  %v802_v23 = vrot.slane %v801_v14, 2  ;;  %v775_v41 = vsel %vm496_vm5, %v753_v20, %v774_v33 }
 0x449   :  { %v729_v57 = vpop.permute.xlu0 %728  ;;  %v814_v60 = vrot.slane %v813_v51, 4  ;;  %v809_v16 = vrot.slane %v808_v63, 2 }
 0x44a   :  { %v794_v58 = vmul.f32 %v729_v57, %v1318_v17  ;;  %v757_v25 = vrot.slane %v729_v57, %v1363_v42  ;;  %v803_v43 = vadd.f32 %v802_v23, %v801_v14 }
 0x44b   :  { %v815_v0 = vadd.f32 %v814_v60, %v813_v51  ;;  %v810_v37 = vadd.f32 %v809_v16, %v808_v63 }
 0x44c   :  { %v820_v61 = vsel %vm92_vm0, %v794_v58, 0.0  ;;  %v776_v4 = vsel %vm498_vm6, %v757_v25, %v775_v41  ;;  %v804_v55 = vrot.slane %v803_v43, 1 }
 0x44d   :  { %v821_v12 = vrot.slane %v820_v61, 4  ;;  %v732_v62 = vpop.permute.xlu0 %731  ;;  %v811_v49 = vrot.slane %v810_v37, 1 }
 0x44e   :  { %v795_v7 = vmul.f32 %v732_v62, %v1322_v18  ;;  %v816_v18 = vrot.slane %v815_v0, 2  ;;  %v761_v29 = vrot.slane %v732_v62, %v1363_v42 }
 0x44f   :  { %v822_v6 = vadd.f32 %v821_v12, %v820_v61 }
 0x450   :  { %v827_v1 = vsel %vm92_vm0, %v795_v7, 0.0  ;;  %v817_v3 = vadd.f32 %v816_v18, %v815_v0  ;;  %v777_v39 = vsel %vm500_vm7, %v761_v29, %v776_v4 }
 0x451   :  { %v828_v8 = vrot.slane %v827_v1, 4  ;;  %v735_v9 = vpop.permute.xlu0 %734  ;;  %v823_v28 = vrot.slane %v822_v6, 2 }
 0x452   :  { %v796_v17 = vmul.f32 %v735_v9, %v1328_v19  ;;  %v765_v35 = vrot.slane %v735_v9, %v1363_v42  ;;  %v818_v53 = vrot.slane %v817_v3, 1 }
 0x453   :  { %v829_v21 = vadd.f32 %v828_v8, %v827_v1  ;;  %v824_v13 = vadd.f32 %v823_v28, %v822_v6 }
 0x454   :  { %v834_v27 = vsel %vm92_vm0, %v796_v17, 0.0  ;;  %v778_v47 = vsel %vm502_vm8, %v765_v35, %v777_v39 }
 0x455   :  { %v835_v31 = vrot.slane %v834_v27, 4  ;;  %v738_v32 = vpop.permute.xlu0 %737  ;;  %v830_v19 = vrot.slane %v829_v21, 2  ;;  %v825_v50 = vrot.slane %v824_v13, 1 }
 0x456   :  { %v797_v36 = vmul.f32 %v738_v32, %v1300_v5  ;;  %v769_v2 = vrot.slane %v738_v32, %v1363_v42 }
 0x457   :  { %v836_v38 = vadd.f32 %v835_v31, %v834_v27  ;;  %v831_v40 = vadd.f32 %v830_v19, %v829_v21 }
 0x458   :  { %v841_v44 = vsel %vm92_vm0, %v797_v36, 0.0  ;;  %v779_v48 = vsel %vm504_vm9, %v769_v2, %v778_v47 }
 0x459   :  { %v837_v46 = vrot.slane %v836_v38, 2  ;;  %v842_v26 = vrot.slane %v841_v44, 4  ;;  %v741_v5 = vpop.permute.xlu0 %740 }
 0x45a   :  { %v773_v30 = vrot.slane %v741_v5, %v1363_v42  ;;  %v798_v45 = vmul.f32 %v741_v5, %v1308_v10  ;;  %v832_v42 = vrot.slane %v831_v40, 1 }
 0x45b   :  { %v838_v24 = vadd.f32 %v837_v46, %v836_v38  ;;  %v843_v34 = vadd.f32 %v842_v26, %v841_v44 }
 0x45c   :  { %v848_v54 = vsel %vm92_vm0, %v798_v45, 0.0  ;;  %v780_v22 = vsel %vm506_vm10, %v773_v30, %v779_v48 }
 0x45d   :  { %v844_v56 = vrot.slane %v843_v34, 2  ;;  %v849_v51 = vrot.slane %v848_v54, 4  ;;  %782 = vst.msk [vmem:[#allocation11] sm:$0xff] %vm509_vm11, %v780_v22 }
 0x45e   :  { %1133 = shalt.err (!%p1130_p8)
}
 0x45f   :  { %s1134_s8 = scalar_lea.hbm %s1533_s7, 128 }
 0x460   :  { %p1135_p9 = scmp.ne.s32.totalorder %s1533_s7, %s1134_s8  ;;  %p1138_p10 = scmp.lt.u32.totalorder %s1134_s8, %s1533_s7 }
 0x462   :  { %p1140_p11 = pnand %p1138_p10, %p1135_p9 }
 0x464   :  { %1143 = shalt.err (!%p1140_p11)
}
 0x465   :  { %891 = dma.vmem_to_hbm [thread:$0]  %s889_s26, 128, %s1533_s7, [#allocation12]   ;;  %v812_v10 = vadd.f32 %v811_v49, %v810_v37  ;;  %v839_v57 = vrot.slane %v838_v24, 1  ;;  %v845_v58 = vadd.f32 %v844_v56, %v843_v34  ;;  %v850_v52 = vadd.f32 %v849_v51, %v848_v54 }
 0x466   :  { %v819_v59 = vadd.f32 %v818_v53, %v817_v3  ;;  %v805_v60 = vadd.f32 %v804_v55, %v803_v43  ;;  %v826_v61 = vadd.f32 %v825_v50, %v824_v13  ;;  %v833_v7 = vadd.f32 %v832_v42, %v831_v40  ;;  %s1188_s7 = smov [#allocation10]  }
 0x467   :  { %v846_v12 = vrot.slane %v845_v58, 1  ;;  %v851_v62 = vrot.slane %v850_v52, 2  ;;  %v840_v14 = vadd.f32 %v839_v57, %v838_v24  ;;  %s878_s0 = sshll.u32 %s1188_s7, 4  ;;  %s879_s0 = int_to_ptr.vmem [resolvable:$true] %s878_s0 }
 0x468   :  { %v863_v63 = vsel %vm494_vm4, %v812_v10, %v805_v60  ;;  %s1144_s27 = scalar_lea.vmem %s879_s0, 128  ;;  %p1149_p13 = scmp.lt.s32.totalorder %s879_s0, %s879_s0 }
 0x469   :  { %v852_v0 = vadd.f32 %v851_v62, %v850_v52  ;;  %v864_v1 = vsel %vm496_vm5, %v819_v59, %v863_v63  ;;  %v847_v6 = vadd.f32 %v846_v12, %v845_v58  ;;  %p1145_p12 = scmp.ne.s32.totalorder %s879_s0, %s1144_s27  ;;  %p1150_p0 = scmp.lt.s32.totalorder %s1144_s27, %s1144_s27 }
 0x46a   :  { %v865_v9 = vsel %vm498_vm6, %v826_v61, %v864_v1 }
 0x46b   :  { %v853_v8 = vrot.slane %v852_v0, 1  ;;  %v866_v11 = vsel %vm500_vm7, %v833_v7, %v865_v9  ;;  %p1151_p1 = por %p1150_p0, %p1149_p13 }
 0x46c   :  { %v867_v15 = vsel %vm502_vm8, %v840_v14, %v866_v11 }
 0x46d   :  { %v854_v17 = vadd.f32 %v853_v8, %v852_v0  ;;  %v868_v16 = vsel %vm504_vm9, %v847_v6, %v867_v15  ;;  %p1152_p2 = pnand %p1151_p1, %p1145_p12 }
 0x46f   :  { %v869_v20 = vsel %vm506_vm10, %v854_v17, %v868_v16 }
 0x470   :  { %871 = vst.msk [vmem:[#allocation10] sm:$0xff] %vm92_vm0, %v869_v20 }
 0x471   :  { %1155 = shalt.err (!%p1152_p2)
}
 0x472   :  { %s1156_s17 = scalar_lea.hbm %s1532_s6, 128 }
 0x473   :  { %p1157_p3 = scmp.ne.s32.totalorder %s1532_s6, %s1156_s17  ;;  %p1160_p4 = scmp.lt.u32.totalorder %s1156_s17, %s1532_s6 }
 0x475   :  { %p1162_p5 = pnand %p1160_p4, %p1157_p3 }
 0x477   :  { %1165 = shalt.err (!%p1162_p5)
}
 0x478   :  { %881 = dma.vmem_to_hbm [thread:$0]  %s879_s0, 128, %s1532_s6, [#allocation4]  }
 0x479   :  { %1172 = dma.done.wait [#allocation4], 128  }
 0x47a   :  { %1173 = vsyncadd [#allocation4], 4294967168 }
 0x47b   :  { %1174 = dma.done.wait [#allocation12], 128  }
 0x47c   :  { %1175 = vsyncadd [#allocation12], 4294967168 }
 0x47d   :  { %898 = vsyncpa [#allocation3], 1 }
 0x47e   :  { %899 = vsyncpa [#allocation6], 1 }
 0x47f   :  { %900 = vsyncpa [#allocation9], 1 }
 0x480   :  { %901 = vsyncpa [#allocation4], 1 }
 0x481   :  { %902 = vsyncpa [#allocation12], 1 }

</bundles_post_ra>
